<compile_context>
chip_gen: v7x
topology: tpu7x:2x2x1
jax: 0.10.0
libtpu: 0.0.40
codegen_flags: <defaults>
</compile_context>

<pallas_src>
import functools

import jax
import jax.numpy as jnp
from jax import lax
from jax.experimental import pallas as pl
from jax.experimental.pallas import tpu as pltpu

LANES = 128
SUBLANES = 8
CHUNK = SUBLANES * LANES  # 1024: alignment unit for the Pallas main path


def _device_kind():
    try:
        return jax.devices()[0].device_kind.lower()
    except Exception:
        return ""


def _tuning():
    """Returns (row_tile, tensorcores_per_chip, vmem_limit_bytes_or_None)."""
    kind = _device_kind()
    if "v7" in kind or "tpu7" in kind:
        return 8192, 2, 32 * 1024 * 1024   # 2 TCs; stay under 32 MiB scoped
    if "v6" in kind:
        return 8192, 1, 32 * 1024 * 1024
    if "v5" in kind:
        return 4096, 1, 32 * 1024 * 1024   # 8 MiB of buffers, comfortable
    return 2048, 1, None                   # unknown / older chips: conservative


def _focal_terms(p, t, gamma, binary_targets):
    """Elementwise focal term WITHOUT alpha: (1-pt)**gamma * BCE, in f32."""
    if binary_targets:
        # For t in {0,1}: q = prob of the correct class.
        # pt = q (instead of exp(-clamped bce)) differs only when q < e^-100,
        # which is below f32 resolution of the reduced mean.
        q = jnp.where(t >= 0.5, p, 1.0 - p)
        bce = -jnp.maximum(jnp.log(q), -100.0)
        pt = q
    else:
        log_p = jnp.maximum(jnp.log(p), -100.0)
        log_1mp = jnp.maximum(jnp.log(1.0 - p), -100.0)
        bce = -(log_1mp + t * (log_p - log_1mp))
        pt = jnp.exp(-bce)
    one_m_pt = 1.0 - pt
    if float(gamma) == int(gamma) and int(gamma) >= 0:
        mod = lax.integer_pow(one_m_pt, int(gamma))   # gamma=2 -> one VPU mul
    else:
        mod = one_m_pt ** jnp.float32(gamma)
    return mod * bce


def _focal_sum_kernel(p_ref, t_ref, out_ref, acc_ref, *,
                      gamma, binary_targets, rows, n_blk, bpc,
                      n_grid_blocks, grid_ndim):
    if grid_ndim == 2:
        c = pl.program_id(0)
        i = pl.program_id(1)
        blk = c * bpc + i                 # logical row-block index
        n_inner = pl.num_programs(1)
    else:
        i = pl.program_id(0)
        blk = i
        n_inner = pl.num_programs(0)

    row_tile = p_ref.shape[0]

    @pl.when(i == 0)
    def _():
        acc_ref[...] = jnp.zeros_like(acc_ref)

    f = _focal_terms(p_ref[...].astype(jnp.float32),
                     t_ref[...].astype(jnp.float32),
                     gamma, binary_targets)

    def _accum(vals):
        # Fold into one vreg-shaped (8,128) partial sum: pure VPU adds; the
        # tiny cross-lane reduce is deferred to the wrapper.
        acc_ref[...] += vals.reshape(row_tile // SUBLANES, SUBLANES, LANES).sum(axis=0)

    last = n_blk - 1
    has_partial = (rows % row_tile) != 0   # Pallas partial last block exists
    has_dups = n_grid_blocks > n_blk       # clamped duplicate blocks (core axis)

    if has_partial or has_dups:
        @pl.when(blk < last)
        def _():
            _accum(f)                      # interior blocks: unmasked

        @pl.when(blk == last)
        def _():
            if has_partial:
                valid_rows = rows - last * row_tile
                ridx = lax.broadcasted_iota(jnp.int32, (row_tile, LANES), 0)
                _accum(jnp.where(ridx < valid_rows, f, 0.0))
            else:
                _accum(f)
        # blk > last (clamped duplicate on the core axis): contributes nothing.
    else:
        _accum(f)

    @pl.when(i == n_inner - 1)
    def _():
        out_ref[0] = acc_ref[...]


def focal_loss(inputs, targets, *, alpha=1.0, gamma=2.0, binary_targets=True):
    """Pallas focal loss, module defaults: logits=False, reduce=True.

    binary_targets=True uses the 1-transcendental fast path (exact for {0,1}
    targets up to sub-f32-resolution differences); pass False for soft targets
    to reproduce the PyTorch 2-log + exp formulation.
    """
    assert inputs.shape == targets.shape
    n = int(inputs.size)
    if n == 0:
        return jnp.float32(float("nan"))   # torch.mean of an empty tensor

    flat_p = inputs.reshape(-1)
    flat_t = targets.reshape(-1)

    n_main = (n // CHUNK) * CHUNK
    total = jnp.float32(0.0)

    if n_main > 0:
        rows = n_main // LANES
        p_main = flat_p if n_main == n else flat_p[:n_main]
        t_main = flat_t if n_main == n else flat_t[:n_main]
        p2d = p_main.reshape(rows, LANES)
        t2d = t_main.reshape(rows, LANES)

        row_tile_max, ncores, vmem_limit = _tuning()
        row_tile = min(row_tile_max, rows)   # rows % 8 == 0  =>  constraint OK
        n_blk = pl.cdiv(rows, row_tile)
        ncores = min(ncores, n_blk)          # never more cores than blocks

        if ncores > 1:
            bpc = pl.cdiv(n_blk, ncores)     # row-blocks per core
            grid = (ncores, bpc)
            dims = (pltpu.CORE_PARALLEL, pltpu.ARBITRARY)
            # Clamp so out-of-range logical blocks stay in-bounds; their
            # contribution is skipped inside the kernel.
            in_map = lambda c, i: (jnp.minimum(c * bpc + i, n_blk - 1), 0)
            out_map = lambda c, i: (c, 0, 0)
            grid_ndim = 2
        else:
            bpc = n_blk
            grid = (n_blk,)
            dims = (pltpu.ARBITRARY,)
            in_map = lambda i: (i, 0)
            out_map = lambda i: (0, 0, 0)
            grid_ndim = 1

        kernel = functools.partial(
            _focal_sum_kernel,
            gamma=float(gamma),
            binary_targets=bool(binary_targets),
            rows=rows, n_blk=n_blk, bpc=bpc,
            n_grid_blocks=ncores * bpc, grid_ndim=grid_ndim,
        )

        cp_kwargs = dict(dimension_semantics=dims)
        if vmem_limit is not None:
            cp_kwargs["vmem_limit_bytes"] = vmem_limit

        partials = pl.pallas_call(
            kernel,
            out_shape=jax.ShapeDtypeStruct((ncores, SUBLANES, LANES), jnp.float32),
            grid_spec=pltpu.PrefetchScalarGridSpec(
                num_scalar_prefetch=0,
                grid=grid,
                in_specs=[
                    pl.BlockSpec((row_tile, LANES), in_map),
                    pl.BlockSpec((row_tile, LANES), in_map),
                ],
                out_specs=pl.BlockSpec((1, SUBLANES, LANES), out_map),
                scratch_shapes=[pltpu.VMEM((SUBLANES, LANES), jnp.float32)],
            ),
            compiler_params=pltpu.CompilerParams(**cp_kwargs),
        )(p2d, t2d)

        # Tiny glue: final cross-lane reduce of ncores*8*128 partials.
        total = total + jnp.sum(partials)

    n_tail = n - n_main
    if n_tail > 0:
        # < 1024 leftover elements: plain jnp -- avoids re-streaming the whole
        # tensor through a concatenate-pad just to align the tail.
        tail_p = flat_p[n_main:].astype(jnp.float32)
        tail_t = flat_t[n_main:].astype(jnp.float32)
        total = total + jnp.sum(
            _focal_terms(tail_p, tail_t, float(gamma), bool(binary_targets)))

    # alpha applied once here instead of per element in the kernel.
    return jnp.float32(alpha) * total / jnp.float32(n)


def focal_loss_ref(inputs, targets, *, alpha=1.0, gamma=2.0):
    p = inputs.astype(jnp.float32)
    t = targets.astype(jnp.float32)
    bce = -(t * jnp.maximum(jnp.log(p), -100.0)
            + (1.0 - t) * jnp.maximum(jnp.log(1.0 - p), -100.0))
    pt = jnp.exp(-bce)
    return jnp.mean(alpha * (1.0 - pt) ** gamma * bce)


if __name__ == "__main__":
    key = jax.random.PRNGKey(0)
    k1, k2, k3, k4, k5, k6, k7 = jax.random.split(key, 7)

    # NCHW: batch=2, channels=4, spatial=16x16. logits=False -> inputs are probs.
    x = jax.nn.sigmoid(jax.random.normal(k1, (2, 4, 16, 16), jnp.float32))
    t_bin = jax.random.bernoulli(k2, 0.5, (2, 4, 16, 16)).astype(jnp.float32)
    out = jax.block_until_ready(focal_loss(x, t_bin))
    ref = focal_loss_ref(x, t_bin)
    assert jnp.allclose(out, ref, rtol=1e-4, atol=1e-6), (out, ref)

    # Soft-target (generic, PyTorch-exact) path.
    t_soft = jax.random.uniform(k3, (2, 4, 16, 16), jnp.float32)
    out_s = jax.block_until_ready(focal_loss(x, t_soft, binary_targets=False))
    ref_s = focal_loss_ref(x, t_soft)
    assert jnp.allclose(out_s, ref_s, rtol=1e-4, atol=1e-6), (out_s, ref_s)

    # Misaligned size: exercises the aligned-prefix + jnp-tail split.
    xm = jax.nn.sigmoid(jax.random.normal(k4, (3, 700), jnp.float32))
    tm = jax.random.bernoulli(k5, 0.5, (3, 700)).astype(jnp.float32)
    out_m = jax.block_until_ready(focal_loss(xm, tm))
    ref_m = focal_loss_ref(xm, tm)
    assert jnp.allclose(out_m, ref_m, rtol=1e-4, atol=1e-6), (out_m, ref_m)

    # Large input with a partial last row-block: exercises the gated row mask.
    xl = jax.nn.sigmoid(jax.random.normal(k6, (8200, 128), jnp.float32))
    tl = jax.random.bernoulli(k7, 0.5, (8200, 128)).astype(jnp.float32)
    out_l = jax.block_until_ready(focal_loss(xl, tl))
    ref_l = focal_loss_ref(xl, tl)
    assert jnp.allclose(out_l, ref_l, rtol=1e-4, atol=1e-6), (out_l, ref_l)

    print("KERNEL_OK")
</pallas_src>

<mosaic_0001>
module attributes {stable_mosaic.version = 11 : i64} {
  func.func @_focal_sum_kernel(%arg0: i32, %arg1: memref<16x128xf32, #tpu.memory_space<vmem>>, %arg2: memref<16x128xf32, #tpu.memory_space<vmem>>, %arg3: memref<1x8x128xf32, #tpu.memory_space<vmem>>, %arg4: memref<8x128xf32, #tpu.memory_space<vmem>>) attributes {dimension_semantics = [#tpu.dimension_semantics<arbitrary>], iteration_bounds = array<i64: 1>, scalar_prefetch = 0 : i64, scratch_operands = 1 : i64, tpu.core_type = #tpu.core_type<tc>, window_params = [{transform_indices = @transform_0, window_bounds = array<i64: 16, 128>}, {transform_indices = @transform_1, window_bounds = array<i64: 16, 128>}, {pipeline_mode = #tpu.pipeline_mode<synchronous>, transform_indices = @transform_2, window_bounds = array<i64: 1, 8, 128>}]} {
    %c0_i32 = arith.constant 0 : i32
    %0 = arith.cmpi eq, %arg0, %c0_i32 : i32
    %1 = arith.extui %0 : i1 to i32
    %c0_i32_0 = arith.constant 0 : i32
    %2 = arith.cmpi ne, %1, %c0_i32_0 : i32
    scf.if %2 {
      %cst_15 = arith.constant 0.000000e+00 : f32
      %27 = vector.broadcast %cst_15 : f32 to vector<8x128xf32>
      %c0_16 = arith.constant 0 : index
      %c0_17 = arith.constant 0 : index
      %28 = vector.load %arg4[%c0_16, %c0_17] : memref<8x128xf32, #tpu.memory_space<vmem>>, vector<8x128xf32>
      tpu.vector_store %arg4[%c0_16, %c0_17], %27 {strides = array<i32>} : memref<8x128xf32, #tpu.memory_space<vmem>>, vector<8x128xf32>,
    } else {
    }
    %c0 = arith.constant 0 : index
    %c0_1 = arith.constant 0 : index
    %3 = vector.load %arg1[%c0, %c0_1] : memref<16x128xf32, #tpu.memory_space<vmem>>, vector<16x128xf32>
    %c0_2 = arith.constant 0 : index
    %c0_3 = arith.constant 0 : index
    %4 = vector.load %arg2[%c0_2, %c0_3] : memref<16x128xf32, #tpu.memory_space<vmem>>, vector<16x128xf32>
    %cst = arith.constant 5.000000e-01 : f32
    %5 = vector.broadcast %cst : f32 to vector<16x128xf32>
    %6 = arith.cmpf oge, %4, %5 : vector<16x128xf32>
    %cst_4 = arith.constant 1.000000e+00 : f32
    %7 = vector.broadcast %cst_4 : f32 to vector<16x128xf32>
    %8 = arith.subf %7, %3 : vector<16x128xf32>
    %9 = arith.select %6, %3, %8 : vector<16x128xi1>, vector<16x128xf32>
    %10 = math.log %9 : vector<16x128xf32>
    %cst_5 = arith.constant -1.000000e+02 : f32
    %11 = vector.broadcast %cst_5 : f32 to vector<16x128xf32>
    %12 = arith.maximumf %10, %11 : vector<16x128xf32>
    %cst_6 = arith.constant 0.000000e+00 : f32
    %13 = vector.broadcast %cst_6 : f32 to vector<16x128xf32>
    %14 = arith.subf %13, %12 : vector<16x128xf32>
    %cst_7 = arith.constant 1.000000e+00 : f32
    %15 = vector.broadcast %cst_7 : f32 to vector<16x128xf32>
    %16 = arith.subf %15, %9 : vector<16x128xf32>
    %17 = arith.mulf %16, %16 : vector<16x128xf32>
    %18 = arith.mulf %17, %14 : vector<16x128xf32>
    %c0_8 = arith.constant 0 : index
    %c0_9 = arith.constant 0 : index
    %19 = vector.load %arg4[%c0_8, %c0_9] : memref<8x128xf32, #tpu.memory_space<vmem>>, vector<8x128xf32>
    %20 = vector.shape_cast %18 : vector<16x128xf32> to vector<2x8x128xf32>
    %cst_10 = arith.constant dense<0.000000e+00> : vector<8x128xf32>
    %21 = vector.multi_reduction <add>, %20, %cst_10 [0] : vector<2x8x128xf32> to vector<8x128xf32>
    %22 = arith.addf %19, %21 : vector<8x128xf32>
    %c0_11 = arith.constant 0 : index
    %c0_12 = arith.constant 0 : index
    %23 = vector.load %arg4[%c0_11, %c0_12] : memref<8x128xf32, #tpu.memory_space<vmem>>, vector<8x128xf32>
    tpu.vector_store %arg4[%c0_11, %c0_12], %22 {strides = array<i32>} : memref<8x128xf32, #tpu.memory_space<vmem>>, vector<8x128xf32>,
    %c0_i32_13 = arith.constant 0 : i32
    %24 = arith.cmpi eq, %arg0, %c0_i32_13 : i32
    %25 = arith.extui %24 : i1 to i32
    %c0_i32_14 = arith.constant 0 : i32
    %26 = arith.cmpi ne, %25, %c0_i32_14 : i32
    scf.if %26 {
      %c0_15 = arith.constant 0 : index
      %c0_16 = arith.constant 0 : index
      %27 = vector.load %arg4[%c0_15, %c0_16] : memref<8x128xf32, #tpu.memory_space<vmem>>, vector<8x128xf32>
      %c0_17 = arith.constant 0 : index
      %c0_18 = arith.constant 0 : index
      %c0_19 = arith.constant 0 : index
      %28 = vector.load %arg3[%c0_17, %c0_18, %c0_19] : memref<1x8x128xf32, #tpu.memory_space<vmem>>, vector<1x8x128xf32>
      %29 = vector.shape_cast %28 : vector<1x8x128xf32> to vector<8x128xf32>
      %30 = vector.shape_cast %27 : vector<8x128xf32> to vector<1x8x128xf32>
      tpu.vector_store %arg3[%c0_17, %c0_18, %c0_19], %30 {strides = array<i32>} : memref<1x8x128xf32, #tpu.memory_space<vmem>>, vector<1x8x128xf32>,
    } else {
    }
    return
  }
  func.func @transform_0(%arg0: i32) -> (i32, i32) {
    %c0_i32 = arith.constant 0 : i32
    %c0_i32_0 = arith.constant 0 : i32
    return %arg0, %c0_i32 : i32, i32
  }
  func.func @transform_1(%arg0: i32) -> (i32, i32) {
    %c0_i32 = arith.constant 0 : i32
    %c0_i32_0 = arith.constant 0 : i32
    return %arg0, %c0_i32 : i32, i32
  }
  func.func @transform_2(%arg0: i32) -> (i32, i32, i32) {
    %c0_i32 = arith.constant 0 : i32
    %c0_i32_0 = arith.constant 0 : i32
    %c0_i32_1 = arith.constant 0 : i32
    %c0_i32_2 = arith.constant 0 : i32
    return %c0_i32, %c0_i32_0, %c0_i32_1 : i32, i32, i32
  }
}

</mosaic_0001>

<bundles_post_ra>
// kernel: tpu_custom_call.1
= control target key start
LH: loop header
LB: loop body
LE: loop exit
PB: predicated region body
PF: predicated region fallthrough
CT: control target
= control target key end

     0   :  { %7 = vsyncpa [#allocation4], 0  ;;  %s231_s0 = inlined_call_operand.hbm [shape: f32[16,128], index: 0, kind: input, shape index: {}]   ;;  %s232_s1 = inlined_call_operand.hbm [shape: f32[16,128], index: 1, kind: input, shape index: {}]   ;;  %s233_s2 = inlined_call_operand.hbm [shape: f32[1,8,128], index: 2, kind: output, shape index: {}]  }
   0x1   :  { %8 = vsyncpa [#allocation7], 0 }
   0x2   :  { %9 = vsyncpa [#allocation5], 0  ;;  %s175_s9 = smov [#allocation3]   ;;  %s103_s13 = scalar_lea.hbm %s231_s0, 256 }
   0x3   :  { %s15_s10 = sshll.u32 %s175_s9, 4  ;;  %p104_p0 = scmp.ne.s32.totalorder %s231_s0, %s103_s13  ;;  %s16_s10 = int_to_ptr.vmem [resolvable:$true] %s15_s10 }
   0x4   :  { %p107_p1 = scmp.lt.u32.totalorder %s103_s13, %s231_s0 }
   0x6   :  { %p109_p2 = pnand %p107_p1, %p104_p0 }
   0x8   :  { %112 = shalt.err (!%p109_p2)
}
   0x9   :  { %s113_s18 = scalar_lea.vmem %s16_s10, 256  ;;  %p118_p4 = scmp.lt.s32.totalorder %s16_s10, %s16_s10 }
   0xa   :  { %p114_p3 = scmp.ne.s32.totalorder %s16_s10, %s113_s18  ;;  %p119_p5 = scmp.lt.s32.totalorder %s113_s18, %s113_s18 }
   0xc   :  { %p120_p6 = por %p119_p5, %p118_p4 }
   0xe   :  { %p121_p7 = pnand %p120_p6, %p114_p3 }
  0x10   :  { %124 = shalt.err (!%p121_p7)
}
  0x11   :  { %s176_s19 = smov 128   ;;  %s177_s20 = smov 8  }
  0x12   :  { %21 = dma.hbm_to_vmem [thread:$0]  %s231_s0, 256, %s16_s10, [#allocation4], %s176_s19, %s176_s19, %s177_s20  }
  0x13   :  { %s178_s23 = smov [#allocation6]   ;;  %s125_s27 = scalar_lea.hbm %s232_s1, 256 }
  0x14   :  { %s27_s24 = sshll.u32 %s178_s23, 4  ;;  %p126_p8 = scmp.ne.s32.totalorder %s232_s1, %s125_s27  ;;  %s28_s24 = int_to_ptr.vmem [resolvable:$true] %s27_s24 }
  0x15   :  { %p129_p9 = scmp.lt.u32.totalorder %s125_s27, %s232_s1 }
  0x17   :  { %p131_p10 = pnand %p129_p9, %p126_p8 }
  0x19   :  { %134 = shalt.err (!%p131_p10)
}
  0x1a   :  { %s135_s4 = scalar_lea.vmem %s28_s24, 256  ;;  %p140_p12 = scmp.lt.s32.totalorder %s28_s24, %s28_s24 }
  0x1b   :  { %p136_p11 = scmp.ne.s32.totalorder %s28_s24, %s135_s4  ;;  %p141_p13 = scmp.lt.s32.totalorder %s135_s4, %s135_s4 }
  0x1d   :  { %p142_p0 = por %p141_p13, %p140_p12 }
  0x1f   :  { %p143_p1 = pnand %p142_p0, %p136_p11 }
  0x21   :  { %146 = shalt.err (!%p143_p1)
}
  0x22   :  { %33 = dma.hbm_to_vmem [thread:$0]  %s232_s1, 256, %s28_s24, [#allocation7], %s176_s19, %s176_s19, %s177_s20  }
  0x23   :  { %169 = dma.done.wait [#allocation4], 256  }
  0x24   :  { %170 = vsyncadd [#allocation4], 4294967040 }
  0x25   :  { %171 = dma.done.wait [#allocation7], 256  }
  0x26   :  { %172 = vsyncadd [#allocation7], 4294967040  ;;  %v45_v0 = vld [vmem:[#allocation3] sm:$0xff]  ;;  %v46_v1 = vld [vmem:[#allocation3 + $0x8] sm:$0xff]  ;;  %s179_s1 = smov [#allocation8]  }
  0x27   :  { %v47_v2 = vld [vmem:[#allocation6] sm:$0xff]  ;;  %v48_v3 = vld [vmem:[#allocation6 + $0x8] sm:$0xff]  ;;  %v51_v4 = vsub.f32 1.0, %v45_v0  ;;  %v52_v5 = vsub.f32 1.0, %v46_v1  ;;  %s84_s6 = sshll.u32 %s179_s1, 4  ;;  %s85_s6 = int_to_ptr.vmem [resolvable:$true] %s84_s6 }
  0x28   :  { %vm49_vm0 = vcmp.ge.f32.partialorder %v47_v2, 0.5  ;;  %vm50_vm1 = vcmp.ge.f32.partialorder %v48_v3, 0.5  ;;  %s147_s7 = scalar_lea.vmem %s85_s6, 128  ;;  %p152_p3 = scmp.lt.s32.totalorder %s85_s6, %s85_s6 }
  0x29   :  { %v53_v6 = vsel %vm49_vm0, %v45_v0, %v51_v4  ;;  %v54_v7 = vsel %vm50_vm1, %v46_v1, %v52_v5  ;;  %p148_p2 = scmp.ne.s32.totalorder %s85_s6, %s147_s7  ;;  %p153_p4 = scmp.lt.s32.totalorder %s147_s7, %s147_s7 }
  0x2a   :  { %99 = vlog2.f32 %v53_v6  ;;  %v63_v8 = vsub.f32 1.0, %v53_v6  ;;  %v64_v10 = vsub.f32 1.0, %v54_v7 }
  0x2b   :  { %101 = vlog2.f32 %v54_v7  ;;  %p154_p5 = por %p153_p4, %p152_p3 }
  0x2c   :  { %v65_v15 = vmul.f32 %v63_v8, %v63_v8  ;;  %v66_v17 = vmul.f32 %v64_v10, %v64_v10 }
  0x2d   :  { %p155_p6 = pnand %p154_p5, %p148_p2 }
  0x34   :  { %v100_v9 = vpop.eup %99 }
  0x35   :  { %v102_v11 = vpop.eup %101  ;;  %v56_v12 = vmul.f32 0.6931472, %v100_v9 }
  0x36   :  { %v58_v13 = vmul.f32 0.6931472, %v102_v11 }
  0x37   :  { %v59_v14 = vmax.f32 %v56_v12, -100.0 }
  0x38   :  { %v60_v16 = vmax.f32 %v58_v13, -100.0 }
  0x39   :  { %v61_v18 = vsub.f32 0.0, %v59_v14 }
  0x3a   :  { %v62_v19 = vsub.f32 0.0, %v60_v16 }
  0x3b   :  { %v67_v20 = vmul.f32 %v65_v15, %v61_v18 }
  0x3c   :  { %v68_v21 = vmul.f32 %v66_v17, %v62_v19 }
  0x3e   :  { %v70_v22 = vadd.f32 %v68_v21, %v67_v20 }
  0x40   :  { %77 = vst [vmem:[#allocation8] sm:$0xff] %v70_v22 }
  0x41   :  { %158 = shalt.err (!%p155_p6)
}
  0x42   :  { %s159_s10 = scalar_lea.hbm %s233_s2, 128 }
  0x43   :  { %p160_p7 = scmp.ne.s32.totalorder %s233_s2, %s159_s10  ;;  %p163_p8 = scmp.lt.u32.totalorder %s159_s10, %s233_s2 }
  0x45   :  { %p165_p9 = pnand %p163_p8, %p160_p7 }
  0x47   :  { %168 = shalt.err (!%p165_p9)
}
  0x48   :  { %87 = dma.vmem_to_hbm [thread:$0]  %s85_s6, 128, %s233_s2, [#allocation5]  }
  0x49   :  { %173 = dma.done.wait [#allocation5], 128  }
  0x4a   :  { %174 = vsyncadd [#allocation5], 4294967168 }
  0x4b   :  { %91 = vsyncpa [#allocation4], 1 }
  0x4c   :  { %92 = vsyncpa [#allocation7], 1 }
  0x4d   :  { %93 = vsyncpa [#allocation5], 1 }

</bundles_post_ra>
